<compile_context>
chip_gen: v6e
topology: v6e:2x2x1
jax: 0.10.0
libtpu: 0.0.40
codegen_flags: <defaults>
</compile_context>

<pallas_src>
import functools

import jax
import jax.numpy as jnp
from jax.experimental import pallas as pl
from jax.experimental.pallas import tpu as pltpu

_LANES = 128


def _round_up(a: int, b: int) -> int:
    return (a + b - 1) // b * b


def _concat_pool_kernel(x_ref, omax_ref, oavg_ref, acc_max, acc_sum, *,
                        s_total: int, tile_s: int, valid_last: int):
    s = pl.program_id(1)
    last = pl.num_programs(1) - 1

    @pl.when(s == 0)
    def _init():
        acc_max[...] = jnp.full_like(acc_max, -jnp.inf)
        acc_sum[...] = jnp.zeros_like(acc_sum)

    def accumulate(valid: int):
        # `valid` is static: number of meaningful lanes in this S block.
        n_full = valid // _LANES
        rem = valid % _LANES
        m = acc_max[...]            # (TR, 128): read scratch once per grid step
        sm = acc_sum[...]
        for j in range(n_full):     # static 128-aligned views: zero-cost, no relayout
            xj = x_ref[:, j * _LANES:(j + 1) * _LANES].astype(jnp.float32)
            m = jnp.maximum(m, xj)
            sm = sm + xj
        if rem:
            # Straddling chunk of the last S block: mask the unspecified VMEM tail.
            xj = x_ref[:, n_full * _LANES:(n_full + 1) * _LANES].astype(jnp.float32)
            lane = jax.lax.broadcasted_iota(jnp.int32, xj.shape, 1)
            ok = lane < rem
            m = jnp.maximum(m, jnp.where(ok, xj, -jnp.inf))
            sm = sm + jnp.where(ok, xj, 0.0)
        # Chunks entirely past `valid` are never even loaded.
        acc_max[...] = m            # write scratch back once per grid step
        acc_sum[...] = sm

    if valid_last == tile_s:
        accumulate(tile_s)                     # every block is full: one mask-free path
    else:
        @pl.when(s != last)
        def _interior():
            accumulate(tile_s)                 # interior blocks: mask-free

        @pl.when(s == last)
        def _tail():
            accumulate(valid_last)             # only the last S block pays the mask

    @pl.when(s == last)
    def _finalize():
        omax_ref[...] = jnp.max(acc_max[...], axis=-1, keepdims=True).astype(omax_ref.dtype)
        mean = jnp.sum(acc_sum[...], axis=-1, keepdims=True) * jnp.float32(1.0 / s_total)
        oavg_ref[...] = mean.astype(oavg_ref.dtype)


def adaptive_concat_pool3d(x):
    """x: (N, C, D, H, W) -> (N, 2*C, 1, 1, 1), equivalent to
    torch.cat([AdaptiveMaxPool3d(1)(x), AdaptiveAvgPool3d(1)(x)], dim=1)."""
    N, C, D, H, W = x.shape
    R = N * C
    S = D * H * W
    itemsize = jnp.dtype(x.dtype).itemsize

    # Row (sublane) tile: multiple of the native sublane packing, capped at 64 so the
    # register-resident accumulators stay small; prefer >= 2 row tiles so the "parallel"
    # axis can shard across both TensorCores on v7x.
    sub = max(8, 32 // itemsize)              # 8 f32, 16 bf16, 32 int8
    TR = min(64, _round_up(R, sub))
    if pl.cdiv(R, TR) < 2 and R > sub:
        TR = _round_up(pl.cdiv(R, 2), sub)

    # Reduction (lane) tile: aim for ~2 MiB per input block, multiple of 128, capped at
    # 16384 so the in-kernel chunk loop is a bounded static unroll.
    target_bytes = 2 * 1024 * 1024
    ts_cap = max(_LANES, (target_bytes // (TR * itemsize)) // _LANES * _LANES)
    TS = min(ts_cap, 16384, _round_up(S, _LANES))

    grid = (pl.cdiv(R, TR), pl.cdiv(S, TS))
    valid_last = S - (grid[1] - 1) * TS       # real lanes in the last S block (static)

    x2 = x.reshape(R, S)                      # metadata-only reshape; NO padding pass

    kernel = functools.partial(
        _concat_pool_kernel, s_total=S, tile_s=TS, valid_last=valid_last)

    out_max, out_avg = pl.pallas_call(
        kernel,
        out_shape=(
            jax.ShapeDtypeStruct((R, 1), x.dtype),
            jax.ShapeDtypeStruct((R, 1), x.dtype),
        ),
        grid_spec=pltpu.PrefetchScalarGridSpec(
            num_scalar_prefetch=0,
            grid=grid,
            in_specs=[pl.BlockSpec((TR, TS), lambda r, s: (r, s))],
            out_specs=(
                pl.BlockSpec((TR, 1), lambda r, s: (r, 0)),
                pl.BlockSpec((TR, 1), lambda r, s: (r, 0)),
            ),
            scratch_shapes=[
                pltpu.VMEM((TR, _LANES), jnp.float32),   # folded running max
                pltpu.VMEM((TR, _LANES), jnp.float32),   # folded running f32 sum
            ],
        ),
        compiler_params=pltpu.CompilerParams(
            dimension_semantics=("parallel", "arbitrary"),
        ),
    )(x2)

    mx = out_max.reshape(N, C, 1, 1, 1)
    av = out_avg.reshape(N, C, 1, 1, 1)
    return jnp.concatenate([mx, av], axis=1)


def _reference(x):
    ref_max = jnp.max(x, axis=(2, 3, 4), keepdims=True)
    ref_avg = jnp.mean(x, axis=(2, 3, 4), keepdims=True)
    return jnp.concatenate([ref_max, ref_avg], axis=1)


if __name__ == "__main__":
    key = jax.random.PRNGKey(0)

    # Primary test: clean shapes (single S block, no masking).
    N, C, D, H, W = 2, 4, 8, 8, 8
    x = jax.random.normal(key, (N, C, D, H, W), dtype=jnp.float32)
    y = adaptive_concat_pool3d(x)
    jax.block_until_ready(y)
    ref = _reference(x)
    assert y.shape == (N, 2 * C, 1, 1, 1)
    assert jnp.allclose(y, ref, atol=1e-5, rtol=1e-5), float(jnp.max(jnp.abs(y - ref)))

    # Secondary test: odd shapes exercise the row tail + lane-tail mask (edge blocks).
    x2 = jax.random.normal(jax.random.PRNGKey(1), (1, 3, 5, 7, 6), dtype=jnp.float32)
    y2 = adaptive_concat_pool3d(x2)
    jax.block_until_ready(y2)
    ref2 = _reference(x2)
    assert y2.shape == (1, 6, 1, 1, 1)
    assert jnp.allclose(y2, ref2, atol=1e-5, rtol=1e-5), float(jnp.max(jnp.abs(y2 - ref2)))

    # Third test: multiple S blocks + multiple row tiles + partial last S block
    # (exercises cross-step accumulation, both pl.when paths, and the tail mask).
    x3 = jax.random.normal(jax.random.PRNGKey(2), (2, 8, 63, 32, 33), dtype=jnp.float32)
    y3 = adaptive_concat_pool3d(x3)
    jax.block_until_ready(y3)
    ref3 = _reference(x3)
    assert y3.shape == (2, 16, 1, 1, 1)
    assert jnp.allclose(y3, ref3, atol=1e-5, rtol=1e-5), float(jnp.max(jnp.abs(y3 - ref3)))

    print("KERNEL_OK")
</pallas_src>

<mosaic_0001>
module attributes {stable_mosaic.version = 11 : i64} {
  func.func @_concat_pool_kernel(%arg0: i32, %arg1: i32, %arg2: memref<8x512xf32, #tpu.memory_space<vmem>>, %arg3: memref<8x1xf32, #tpu.memory_space<vmem>>, %arg4: memref<8x1xf32, #tpu.memory_space<vmem>>, %arg5: memref<8x128xf32, #tpu.memory_space<vmem>>, %arg6: memref<8x128xf32, #tpu.memory_space<vmem>>) attributes {dimension_semantics = [#tpu.dimension_semantics<parallel>, #tpu.dimension_semantics<arbitrary>], iteration_bounds = array<i64: 1, 1>, scalar_prefetch = 0 : i64, scratch_operands = 2 : i64, tpu.core_type = #tpu.core_type<tc>, window_params = [{transform_indices = @transform_0, window_bounds = array<i64: 8, 512>}, {transform_indices = @transform_1, window_bounds = array<i64: 8, 1>}, {transform_indices = @transform_2, window_bounds = array<i64: 8, 1>}]} {
    %c0_i32 = arith.constant 0 : i32
    %0 = arith.cmpi eq, %arg1, %c0_i32 : i32
    %1 = arith.extui %0 : i1 to i32
    %c0_i32_0 = arith.constant 0 : i32
    %2 = arith.cmpi ne, %1, %c0_i32_0 : i32
    scf.if %2 {
      %cst = arith.constant 0xFF800000 : f32
      %22 = vector.broadcast %cst : f32 to vector<8x128xf32>
      %c0_15 = arith.constant 0 : index
      %c0_16 = arith.constant 0 : index
      %23 = vector.load %arg5[%c0_15, %c0_16] : memref<8x128xf32, #tpu.memory_space<vmem>>, vector<8x128xf32>
      tpu.vector_store %arg5[%c0_15, %c0_16], %22 {strides = array<i32>} : memref<8x128xf32, #tpu.memory_space<vmem>>, vector<8x128xf32>,
      %cst_17 = arith.constant 0.000000e+00 : f32
      %24 = vector.broadcast %cst_17 : f32 to vector<8x128xf32>
      %c0_18 = arith.constant 0 : index
      %c0_19 = arith.constant 0 : index
      %25 = vector.load %arg6[%c0_18, %c0_19] : memref<8x128xf32, #tpu.memory_space<vmem>>, vector<8x128xf32>
      tpu.vector_store %arg6[%c0_18, %c0_19], %24 {strides = array<i32>} : memref<8x128xf32, #tpu.memory_space<vmem>>, vector<8x128xf32>,
    } else {
    }
    %c0 = arith.constant 0 : index
    %c0_1 = arith.constant 0 : index
    %3 = vector.load %arg5[%c0, %c0_1] : memref<8x128xf32, #tpu.memory_space<vmem>>, vector<8x128xf32>
    %c0_2 = arith.constant 0 : index
    %c0_3 = arith.constant 0 : index
    %4 = vector.load %arg6[%c0_2, %c0_3] : memref<8x128xf32, #tpu.memory_space<vmem>>, vector<8x128xf32>
    %c0_4 = arith.constant 0 : index
    %c0_5 = arith.constant 0 : index
    %5 = vector.load %arg2[%c0_4, %c0_5] : memref<8x512xf32, #tpu.memory_space<vmem>>, vector<8x128xf32>
    %6 = arith.maximumf %3, %5 : vector<8x128xf32>
    %7 = arith.addf %4, %5 : vector<8x128xf32>
    %c0_6 = arith.constant 0 : index
    %c128 = arith.constant 128 : index
    %8 = vector.load %arg2[%c0_6, %c128] : memref<8x512xf32, #tpu.memory_space<vmem>>, vector<8x128xf32>
    %9 = arith.maximumf %6, %8 : vector<8x128xf32>
    %10 = arith.addf %7, %8 : vector<8x128xf32>
    %c0_7 = arith.constant 0 : index
    %c256 = arith.constant 256 : index
    %11 = vector.load %arg2[%c0_7, %c256] : memref<8x512xf32, #tpu.memory_space<vmem>>, vector<8x128xf32>
    %12 = arith.maximumf %9, %11 : vector<8x128xf32>
    %13 = arith.addf %10, %11 : vector<8x128xf32>
    %c0_8 = arith.constant 0 : index
    %c384 = arith.constant 384 : index
    %14 = vector.load %arg2[%c0_8, %c384] : memref<8x512xf32, #tpu.memory_space<vmem>>, vector<8x128xf32>
    %15 = arith.maximumf %12, %14 : vector<8x128xf32>
    %16 = arith.addf %13, %14 : vector<8x128xf32>
    %c0_9 = arith.constant 0 : index
    %c0_10 = arith.constant 0 : index
    %17 = vector.load %arg5[%c0_9, %c0_10] : memref<8x128xf32, #tpu.memory_space<vmem>>, vector<8x128xf32>
    tpu.vector_store %arg5[%c0_9, %c0_10], %15 {strides = array<i32>} : memref<8x128xf32, #tpu.memory_space<vmem>>, vector<8x128xf32>,
    %c0_11 = arith.constant 0 : index
    %c0_12 = arith.constant 0 : index
    %18 = vector.load %arg6[%c0_11, %c0_12] : memref<8x128xf32, #tpu.memory_space<vmem>>, vector<8x128xf32>
    tpu.vector_store %arg6[%c0_11, %c0_12], %16 {strides = array<i32>} : memref<8x128xf32, #tpu.memory_space<vmem>>, vector<8x128xf32>,
    %c0_i32_13 = arith.constant 0 : i32
    %19 = arith.cmpi eq, %arg1, %c0_i32_13 : i32
    %20 = arith.extui %19 : i1 to i32
    %c0_i32_14 = arith.constant 0 : i32
    %21 = arith.cmpi ne, %20, %c0_i32_14 : i32
    scf.if %21 {
      %c0_15 = arith.constant 0 : index
      %c0_16 = arith.constant 0 : index
      %22 = vector.load %arg5[%c0_15, %c0_16] : memref<8x128xf32, #tpu.memory_space<vmem>>, vector<8x128xf32>
      %cst = arith.constant dense<0xFF800000> : vector<8xf32>
      %23 = vector.multi_reduction <maximumf>, %22, %cst [1] : vector<8x128xf32> to vector<8xf32>
      %24 = vector.shape_cast %23 : vector<8xf32> to vector<8x1xf32>
      %c0_17 = arith.constant 0 : index
      %c0_18 = arith.constant 0 : index
      %25 = vector.load %arg3[%c0_17, %c0_18] : memref<8x1xf32, #tpu.memory_space<vmem>>, vector<8x1xf32>
      tpu.vector_store %arg3[%c0_17, %c0_18], %24 {strides = array<i32>} : memref<8x1xf32, #tpu.memory_space<vmem>>, vector<8x1xf32>,
      %c0_19 = arith.constant 0 : index
      %c0_20 = arith.constant 0 : index
      %26 = vector.load %arg6[%c0_19, %c0_20] : memref<8x128xf32, #tpu.memory_space<vmem>>, vector<8x128xf32>
      %cst_21 = arith.constant dense<0.000000e+00> : vector<8xf32>
      %27 = vector.multi_reduction <add>, %26, %cst_21 [1] : vector<8x128xf32> to vector<8xf32>
      %28 = vector.shape_cast %27 : vector<8xf32> to vector<8x1xf32>
      %cst_22 = arith.constant 0.001953125 : f32
      %29 = vector.broadcast %cst_22 : f32 to vector<8x1xf32>
      %30 = arith.mulf %28, %29 : vector<8x1xf32>
      %c0_23 = arith.constant 0 : index
      %c0_24 = arith.constant 0 : index
      %31 = vector.load %arg4[%c0_23, %c0_24] : memref<8x1xf32, #tpu.memory_space<vmem>>, vector<8x1xf32>
      tpu.vector_store %arg4[%c0_23, %c0_24], %30 {strides = array<i32>} : memref<8x1xf32, #tpu.memory_space<vmem>>, vector<8x1xf32>,
    } else {
    }
    return
  }
  func.func @transform_0(%arg0: i32, %arg1: i32) -> (i32, i32) {
    %c0_i32 = arith.constant 0 : i32
    return %arg0, %arg1 : i32, i32
  }
  func.func @transform_1(%arg0: i32, %arg1: i32) -> (i32, i32) {
    %c0_i32 = arith.constant 0 : i32
    %c0_i32_0 = arith.constant 0 : i32
    return %arg0, %c0_i32 : i32, i32
  }
  func.func @transform_2(%arg0: i32, %arg1: i32) -> (i32, i32) {
    %c0_i32 = arith.constant 0 : i32
    %c0_i32_0 = arith.constant 0 : i32
    return %arg0, %c0_i32 : i32, i32
  }
}

</mosaic_0001>

<bundles_post_ra>
// kernel: tpu_custom_call.1
= control target key start
LH: loop header
LB: loop body
LE: loop exit
PB: predicated region body
PF: predicated region fallthrough
CT: control target
= control target key end

     0   :  { %8 = vsyncpa [#allocation5], 0  ;;  %s89_s9 = smov [#allocation4]   ;;  %s114_s0 = inlined_call_operand.hbm [shape: f32[8,512], index: 0, kind: input, shape index: {}]   ;;  %s115_s1 = inlined_call_operand.vmem [shape: f32[8,1], index: 1, kind: output, shape index: {0}]   ;;  %s116_s2 = inlined_call_operand.vmem [shape: f32[8,1], index: 2, kind: output, shape index: {1}]  }
   0x1   :  { %s15_s10 = sshll.u32 %s89_s9, 4  ;;  %s16_s10 = int_to_ptr.vmem [resolvable:$true] %s15_s10 }
   0x2   :  { %s75_s11 = scalar_lea.vmem %s16_s10, 512  ;;  %p80_p1 = scmp.lt.s32.totalorder %s16_s10, %s16_s10 }
   0x3   :  { %p76_p0 = scmp.ne.s32.totalorder %s16_s10, %s75_s11  ;;  %p81_p2 = scmp.lt.s32.totalorder %s75_s11, %s75_s11 }
   0x5   :  { %p82_p3 = por %p81_p2, %p80_p1 }
   0x7   :  { %p83_p4 = pnand %p82_p3, %p76_p0 }
   0x9   :  { %86 = shalt.err (!%p83_p4)
}
   0xa   :  { %18 = dma.hbm_to_vmem [thread:$0]  %s114_s0, 512, %s16_s10, [#allocation5]  }
   0xb   :  { %87 = dma.done.wait [#allocation5], 512  }
   0xc   :  { %88 = vsyncadd [#allocation5], 4294966784  ;;  %v30_v0 = vld [vmem:[#allocation4] sm:$0xff]  ;;  %v33_v1 = vld [vmem:[#allocation4 + $0x8] sm:$0xff]  ;;  %vm50_vm0 = vcmask 7168  }
   0xd   :  { %v36_v2 = vld [vmem:[#allocation4 + $0x10] sm:$0xff]  ;;  %v35_v3 = vadd.f32 %v33_v1, %v30_v0  ;;  %v34_v4 = vmax.f32 %v30_v0, %v33_v1  ;;  %v39_v5 = vld [vmem:[#allocation4 + $0x18] sm:$0xff] }
   0xf   :  { %v38_v6 = vadd.f32 %v36_v2, %v35_v3  ;;  %v37_v7 = vmax.f32 %v34_v4, %v36_v2 }
  0x11   :  { %v41_v8 = vadd.f32 %v39_v5, %v38_v6  ;;  %v40_v9 = vmax.f32 %v37_v7, %v39_v5 }
  0x13   :  { %53 = vadd.xlane.f32.xlu0 %v41_v8 }
  0x17   :  { %48 = vmax.xlane.f32.xlu0 %v40_v9 }
  0x9c   :  { %v54_v10 = vpop.xlane.xlu0 %53 }
  0x9d   :  { %v55_v11 = vmul.f32 0.001953125, %v54_v10 }
  0x9f   :  { %56 = vst.msk [vmem:[%s116_s2] sm:$0xff] %vm50_vm0, %v55_v11 }
  0xa0   :  { %v49_v12 = vpop.xlane.xlu0 %48 }
  0xa1   :  { %51 = vst.msk [vmem:[%s115_s1] sm:$0xff] %vm50_vm0, %v49_v12 }
  0xa2   :  { %65 = vsyncpa [#allocation5], 1 }

</bundles_post_ra>
